<compile_context>
chip_gen: v7x
topology: tpu7x:2x2x1
jax: 0.10.0
libtpu: 0.0.40
codegen_flags: <defaults>
</compile_context>

<pallas_src>
import functools

import jax
import jax.numpy as jnp
from jax.experimental import pallas as pl
from jax.experimental.pallas import tpu as pltpu


# --------------------------------------------------------------------------
# Pallas kernels
# --------------------------------------------------------------------------
def _matmul_fused_kernel(*refs, relu, has_res):
    """One (tm, tn) output tile: o = act(A @ B + bias [+ residual]).

    Full-K blocks (no reduction grid axis): bf16 operands on the MXU with f32
    accumulation; bias / residual-add / ReLU fused in the VPU epilogue.
    """
    if has_res:
        a_ref, b_ref, bias_ref, res_ref, o_ref = refs
    else:
        a_ref, b_ref, bias_ref, o_ref = refs
        res_ref = None

    acc = jnp.dot(a_ref[...], b_ref[...], preferred_element_type=jnp.float32)
    acc = acc + bias_ref[...]
    if res_ref is not None:
        acc = acc + res_ref[...].astype(jnp.float32)
    if relu:
        acc = jnp.maximum(acc, 0.0)
    o_ref[...] = acc.astype(o_ref.dtype)


def _cls_max_kernel(x_ref, w_ref, b_ref, o_ref):
    """x1 = x @ w + b  (classifier, out_features=1), then max over dim 0."""
    x1 = jnp.sum(x_ref[...] * w_ref[...], axis=-1, keepdims=True) + b_ref[...]
    o_ref[...] = jnp.max(x1, axis=0, keepdims=True)


# --------------------------------------------------------------------------
# Pallas wrappers
# --------------------------------------------------------------------------
def _round_up(x, m):
    return ((x + m - 1) // m) * m


def _tile_m(m):
    """Return (padded_M, tm).  tm capped at 256 so the M grid axis splits
    (v7x megacore) and a single A tile can never blow past VMEM."""
    if m <= 256:
        return m, m                      # full-M block (legal even if m % 8 != 0)
    for t in (256, 128, 64, 32, 16, 8):
        if m % t == 0:
            return m, t
    mp = _round_up(m, 256)
    return mp, 256


def _tile_n(n):
    for t in (512, 256, 128):
        if n % t == 0:
            return t
    return n                              # full-N block (legal when n < 128, e.g. 64)


def pallas_matmul(a, b, bias, *, relu=False, residual=None,
                  out_dtype=jnp.bfloat16):
    """act(a @ b + bias [+ residual]) with bf16 MXU operands, f32 accumulate.

    a: (M, K) any float dtype; b: (K, N) bf16 pre-cast at init;
    bias: (1, N) f32 pre-shaped at init; residual: optional (M, N).
    """
    M, K = a.shape
    Kb, N = b.shape
    assert K == Kb, (K, Kb)

    a = a.astype(jnp.bfloat16)
    mp, tm = _tile_m(M)
    tn = _tile_n(N)
    if mp != M:
        a = jnp.pad(a, ((0, mp - M), (0, 0)))
    if residual is not None:
        residual = residual.astype(jnp.bfloat16)
        if mp != M:
            residual = jnp.pad(residual, ((0, mp - M), (0, 0)))

    in_specs = [
        pl.BlockSpec((tm, K), lambda i, j: (i, 0)),   # A: full-K block
        pl.BlockSpec((K, tn), lambda i, j: (0, j)),   # B: full-K block
        pl.BlockSpec((1, tn), lambda i, j: (0, j)),   # bias
    ]
    args = [a, b, bias]
    if residual is not None:
        in_specs.append(pl.BlockSpec((tm, tn), lambda i, j: (i, j)))
        args.append(residual)

    out = pl.pallas_call(
        functools.partial(_matmul_fused_kernel, relu=relu,
                          has_res=residual is not None),
        out_shape=jax.ShapeDtypeStruct((mp, N), out_dtype),
        grid=(mp // tm, N // tn),
        in_specs=in_specs,
        out_specs=pl.BlockSpec((tm, tn), lambda i, j: (i, j)),
        compiler_params=pltpu.CompilerParams(
            dimension_semantics=("parallel", "parallel"),
            vmem_limit_bytes=32 * 1024 * 1024),
    )(*args)
    return out[:M] if mp != M else out


def classifier_max(x, w_row, b):
    """x: (N, 512) f32, w_row: (1, 512), b: (1, 1) -> max over dim0 of x@w.T+b."""
    N, D = x.shape
    return pl.pallas_call(
        _cls_max_kernel,
        out_shape=jax.ShapeDtypeStruct((1, 1), jnp.float32),
        grid=(1,),
        in_specs=[
            pl.BlockSpec((N, D), lambda i: (0, 0)),
            pl.BlockSpec((1, D), lambda i: (0, 0)),
            pl.BlockSpec((1, 1), lambda i: (0, 0)),
        ],
        out_specs=pl.BlockSpec((1, 1), lambda i: (0, 0)),
    )(x.astype(jnp.float32), w_row, b)


def conv2d_pallas(x, layer, stride=1, padding=0, relu=False, residual=None):
    """x: NHWC bf16.  1x1 convs = plain matmul (free reshape, no im2col);
    kxk convs use a bf16 im2col.  BN folded into the weight at init.
    Optional `residual` (same shape as output) is added + ReLU'd in-kernel."""
    w2d, bias = layer["w"], layer["b"]
    kh, kw, cout, kp = layer["kh"], layer["kw"], layer["cout"], layer["kp"]
    N, H, W, Cin = x.shape

    if kh == 1 and kw == 1 and padding == 0:
        if stride > 1:
            x = x[:, ::stride, ::stride, :]
        Ho, Wo = x.shape[1], x.shape[2]
        a = x.reshape(N * Ho * Wo, Cin)
    else:
        if padding:
            x = jnp.pad(x, ((0, 0), (padding, padding),
                            (padding, padding), (0, 0)))
        Hp, Wp = x.shape[1], x.shape[2]
        Ho = (Hp - kh) // stride + 1
        Wo = (Wp - kw) // stride + 1
        patches = [x[:, dy:dy + stride * Ho:stride,
                     dx:dx + stride * Wo:stride, :]
                   for dy in range(kh) for dx in range(kw)]
        if kp > kh * kw * Cin:   # zero-fill to match the K-padded weight rows
            patches.append(jnp.zeros((N, Ho, Wo, kp - kh * kw * Cin), x.dtype))
        a = jnp.concatenate(patches, axis=-1).reshape(N * Ho * Wo, kp)

    res2d = None if residual is None else residual.reshape(N * Ho * Wo, cout)
    out = pallas_matmul(a, w2d, bias, relu=relu, residual=res2d)
    return out.reshape(N, Ho, Wo, cout)


# --------------------------------------------------------------------------
# Plain-JAX glue (pooling)
# --------------------------------------------------------------------------
def maxpool3x3_s2_p1(x):
    N, H, W, C = x.shape
    xp = jnp.pad(x, ((0, 0), (1, 1), (1, 1), (0, 0)),
                 constant_values=-jnp.inf)
    Ho = (H + 2 - 3) // 2 + 1
    Wo = (W + 2 - 3) // 2 + 1
    out = None
    for dy in range(3):
        for dx in range(3):
            s = xp[:, dy:dy + 2 * Ho:2, dx:dx + 2 * Wo:2, :]
            out = s if out is None else jnp.maximum(out, s)
    return out


# --------------------------------------------------------------------------
# Parameter construction (deterministic, synthetic; pre-cast / pre-padded)
# --------------------------------------------------------------------------
_BN_EPS = 1e-5
# Eval-mode BN fold with gamma=1, beta=0, running_mean=0, running_var=1.
_BN_SCALE = 1.0 / (1.0 + _BN_EPS) ** 0.5


def make_conv_bn(key, kh, kw, cin, cout):
    std = (2.0 / (kh * kw * cin)) ** 0.5                 # He init
    w = jax.random.normal(key, (kh, kw, cin, cout), jnp.float32) * std
    w = w * _BN_SCALE                                    # exact eval-mode BN fold
    k_true = kh * kw * cin
    kp = k_true if (kh == 1 and kw == 1) else _round_up(k_true, 128)
    w2d = w.reshape(k_true, cout)
    if kp != k_true:                                     # pad K once, at init
        w2d = jnp.pad(w2d, ((0, kp - k_true), (0, 0)))
    return {"w": w2d.astype(jnp.bfloat16),
            "b": jnp.zeros((1, cout), jnp.float32),
            "kh": kh, "kw": kw, "cin": cin, "cout": cout, "kp": kp}


def make_bottleneck(key, cin, width, stride):
    k = jax.random.split(key, 4)
    blk = {
        "stride": stride,
        "conv1": make_conv_bn(k[0], 1, 1, cin, width),
        "conv2": make_conv_bn(k[1], 3, 3, width, width),
        "conv3": make_conv_bn(k[2], 1, 1, width, width * 4),
    }
    if stride != 1 or cin != width * 4:
        blk["down"] = make_conv_bn(k[3], 1, 1, cin, width * 4)
    return blk


def xavier_linear(key, fan_in, fan_out):
    std = (2.0 / (fan_in + fan_out)) ** 0.5
    w = jax.random.normal(key, (fan_in, fan_out), jnp.float32) * std
    return {"w": w.astype(jnp.bfloat16),
            "b": jnp.zeros((1, fan_out), jnp.float32)}


def xavier_classifier(key, fan_in):
    std = (2.0 / (fan_in + 1)) ** 0.5
    w = jax.random.normal(key, (1, fan_in), jnp.float32) * std
    return {"w": w, "b": jnp.zeros((1, 1), jnp.float32)}


def init_params(key):
    keys = jax.random.split(key, 8)
    params = {"conv1": make_conv_bn(keys[0], 7, 7, 3, 64)}

    cfg = [(3, 64, 1), (4, 128, 2), (6, 256, 2), (3, 512, 2)]  # resnet50 layers
    blocks = []
    cin = 64
    bkeys = jax.random.split(keys[1], sum(n for n, _, _ in cfg))
    bi = 0
    for n, width, stride in cfg:
        for b in range(n):
            s = stride if b == 0 else 1
            blocks.append(make_bottleneck(bkeys[bi], cin, width, s))
            cin = width * 4
            bi += 1
    params["blocks"] = blocks

    params["fc1"] = xavier_linear(keys[2], 2048, 4096)
    params["fc2"] = xavier_linear(keys[3], 4096, 512)
    params["cls"] = xavier_classifier(keys[4], 512)
    return params


# --------------------------------------------------------------------------
# Forward pass
# --------------------------------------------------------------------------
def bottleneck_fwd(x, blk):
    stride = blk["stride"]
    out = conv2d_pallas(x, blk["conv1"], relu=True)
    out = conv2d_pallas(out, blk["conv2"], stride=stride, padding=1, relu=True)
    if "down" in blk:
        xd = x[:, ::stride, ::stride, :] if stride > 1 else x
        identity = conv2d_pallas(xd, blk["down"], relu=False)
    else:
        identity = x
    # conv3: residual add + ReLU fused into the matmul epilogue (no extra
    # HBM round-trip for the elementwise tail).
    return conv2d_pallas(out, blk["conv3"], relu=True, residual=identity)


def resnet_forward(x_nchw, params):
    # NCHW (PyTorch) -> NHWC bf16 (kernel layout / MXU dtype)
    x = jnp.transpose(x_nchw, (0, 2, 3, 1)).astype(jnp.bfloat16)

    # features = resnet50 children()[:-1]
    x = conv2d_pallas(x, params["conv1"], stride=2, padding=3, relu=True)
    x = maxpool3x3_s2_p1(x)
    for blk in params["blocks"]:
        x = bottleneck_fwd(x, blk)
    x = jnp.mean(x.astype(jnp.float32), axis=(1, 2))     # adaptive avg pool
    x = x.astype(jnp.bfloat16)                           # (N, 2048)

    # feature_extractor_part2 (Dropout = identity in eval mode)
    x = pallas_matmul(x, params["fc1"]["w"], params["fc1"]["b"], relu=True)
    x = pallas_matmul(x, params["fc2"]["w"], params["fc2"]["b"], relu=True,
                      out_dtype=jnp.float32)             # (N, 512) f32 features

    # classifier + max over dim 0, reshaped to (1, 1)
    x2 = classifier_max(x, params["cls"]["w"], params["cls"]["b"])
    return x2, x


# --------------------------------------------------------------------------
if __name__ == "__main__":
    key = jax.random.PRNGKey(0)
    kparam, kx = jax.random.split(key)
    params = init_params(kparam)

    # Small input consistent with the module: batch=2, RGB, 32x32 (NCHW).
    x = jax.random.normal(kx, (2, 3, 32, 32), jnp.float32)

    x2, feats = resnet_forward(x, params)
    jax.block_until_ready((x2, feats))

    assert x2.shape == (1, 1) and feats.shape == (2, 512)
    print("KERNEL_OK")
</pallas_src>

<mosaic_0001>
module attributes {stable_mosaic.version = 11 : i64} {
  func.func @_matmul_fused_kernel(%arg0: i32, %arg1: i32, %arg2: memref<256x256xbf16, #tpu.memory_space<vmem>>, %arg3: memref<256x64xbf16, #tpu.memory_space<vmem>>, %arg4: memref<1x64xf32, #tpu.memory_space<vmem>>, %arg5: memref<256x64xbf16, #tpu.memory_space<vmem>>) attributes {dimension_semantics = [#tpu.dimension_semantics<parallel>, #tpu.dimension_semantics<parallel>], iteration_bounds = array<i64: 2, 1>, scalar_prefetch = 0 : i64, scratch_operands = 0 : i64, tpu.core_type = #tpu.core_type<tc>, window_params = [{transform_indices = @transform_0, window_bounds = array<i64: 256, 256>}, {transform_indices = @transform_1, window_bounds = array<i64: 256, 64>}, {transform_indices = @transform_2, window_bounds = array<i64: 1, 64>}, {transform_indices = @transform_3, window_bounds = array<i64: 256, 64>}]} {
    %c0 = arith.constant 0 : index
    %c0_0 = arith.constant 0 : index
    %0 = vector.load %arg2[%c0, %c0_0] : memref<256x256xbf16, #tpu.memory_space<vmem>>, vector<256x256xbf16>
    %c0_1 = arith.constant 0 : index
    %c0_2 = arith.constant 0 : index
    %1 = vector.load %arg3[%c0_1, %c0_2] : memref<256x64xbf16, #tpu.memory_space<vmem>>, vector<256x64xbf16>
    %cst = arith.constant dense<0.000000e+00> : vector<256x64xf32>
    %2 = tpu.matmul %0, %1, %cst {dimension_numbers = #tpu.dot_dimension_numbers<[1], [0], [0], [1], [0, 0, 1, 1], [], []>} : vector<256x256xbf16>, vector<256x64xbf16>, vector<256x64xf32> -> vector<256x64xf32>
    %c0_3 = arith.constant 0 : index
    %c0_4 = arith.constant 0 : index
    %3 = vector.load %arg4[%c0_3, %c0_4] : memref<1x64xf32, #tpu.memory_space<vmem>>, vector<1x64xf32>
    %4 = vector.broadcast %3 : vector<1x64xf32> to vector<256x64xf32>
    %5 = arith.addf %2, %4 : vector<256x64xf32>
    %cst_5 = arith.constant 0.000000e+00 : f32
    %6 = vector.broadcast %cst_5 : f32 to vector<256x64xf32>
    %7 = arith.maximumf %5, %6 : vector<256x64xf32>
    %8 = arith.truncf %7 : vector<256x64xf32> to vector<256x64xbf16>
    %c0_6 = arith.constant 0 : index
    %c0_7 = arith.constant 0 : index
    %9 = vector.load %arg5[%c0_6, %c0_7] : memref<256x64xbf16, #tpu.memory_space<vmem>>, vector<256x64xbf16>
    tpu.vector_store %arg5[%c0_6, %c0_7], %8 {strides = array<i32>} : memref<256x64xbf16, #tpu.memory_space<vmem>>, vector<256x64xbf16>,
    return
  }
  func.func @transform_0(%arg0: i32, %arg1: i32) -> (i32, i32) {
    %c0_i32 = arith.constant 0 : i32
    %c0_i32_0 = arith.constant 0 : i32
    return %arg0, %c0_i32 : i32, i32
  }
  func.func @transform_1(%arg0: i32, %arg1: i32) -> (i32, i32) {
    %c0_i32 = arith.constant 0 : i32
    %c0_i32_0 = arith.constant 0 : i32
    return %c0_i32, %arg1 : i32, i32
  }
  func.func @transform_2(%arg0: i32, %arg1: i32) -> (i32, i32) {
    %c0_i32 = arith.constant 0 : i32
    %c0_i32_0 = arith.constant 0 : i32
    return %c0_i32, %arg1 : i32, i32
  }
  func.func @transform_3(%arg0: i32, %arg1: i32) -> (i32, i32) {
    %c0_i32 = arith.constant 0 : i32
    return %arg0, %arg1 : i32, i32
  }
}

</mosaic_0001>

<bundles_post_ra>
// kernel: tpu_custom_call.1
= control target key start
LH: loop header
LB: loop body
LE: loop exit
PB: predicated region body
PF: predicated region fallthrough
CT: control target
= control target key end

     0   :  { %8 = vsyncpa [#allocation3], 0  ;;  %s1833_s0 = inlined_call_operand.hbm [shape: bf16[512,256], index: 0, kind: input, shape index: {}]   ;;  %s1834_s1 = inlined_call_operand.vmem [shape: bf16[256,64], index: 1, kind: input, shape index: {}]   ;;  %s1835_s2 = inlined_call_operand.vmem [shape: f32[1,64], index: 2, kind: input, shape index: {}]   ;;  %s1836_s3 = inlined_call_operand.vmem [shape: bf16[512,64], index: 3, kind: output, shape index: {}]  }
   0x1   :  { %10 = vsyncpa [#allocation3 + $0x1], 0  ;;  %s1525_s12 = smov 0   ;;  %s1527_s13 = smov 0  }
   0x2   :  { %s1529_s14 = smov 0   ;;  %s1531_s15 = smov 0  }
   0x3   :  { %s1533_s16 = smov 0   ;;  %s1535_s17 = smov 0  }
   0x4 LB: > { %s1040_s18 = sadd.s32 4294967295, %s1500_s17   ;;  %s28_s19 = sadd.s32 1, %s1496_s16  ;;  %s1500_s17 = sphi %s1535_s17, %s16_s17   ;;  %s1496_s16 = sphi %s1533_s16, %s1844_s16   ;;  %s1492_s15 = sphi %s1531_s15, %s1843_s15   ;;  %s1488_s14 = sphi %s1529_s14, %s1842_s14   ;;  %s1484_s13 = sphi %s1527_s13, %s1841_s13   ;;  %s1480_s12 = sphi %s1525_s12, %s1840_s12  }
   0x5   : > { %p30_p0 = scmp.ge.s32.totalorder %s28_s19, 2  ;;  %s35_s20 = sadd.s32 1, %s1488_s14 }
   0x6   : > { %p42_p1 = scmp.ne.s32.totalorder %s1488_s14, %s1484_s13  ;;  %p43_p2 = scmp.eq.s32.totalorder %s1500_s17, 0 }
   0x7   : > { %s1846_s19 = smov (%p30_p0, %s28_s19), 0  ;;  %p48_p4 = scmp.ne.s32.totalorder %s1484_s13, %s1480_s12 }
   0x8   : > { %p1561_p3 = por %p43_p2, %p42_p1  ;;  %s32_s22 = ssub.s32 %s1496_s16, %s1846_s19 }
   0x9   : > { %p49_p5 = scmp.eq.s32.totalorder %s1040_s18, 0  ;;  %p33_p6 = scmp.eq.s32.totalorder %s32_s22, 0 }
   0xa   : > { %p1305_p8 = scmp.lt.s32.totalorder %s1500_s17, 2  ;;  %s165_s25 = sand.u32 1, %s1488_s14  }
   0xb   : > { %p1568_p7 = por %p49_p5, %p48_p4  ;;  %s1138_s26 = sshll.u32 %s1496_s16, 12 }
   0xc   : > { %s1574_s24 = scalar_select %p33_p6, %s1488_s14, %s35_s20  }
   0xd   : > { %s1046_s27 = sshll.u32 %s165_s25, 8  ;;  %s1581_s30 = scalar_lea.hbm %s1833_s0, %s1138_s26 }
   0xe   : > { %s169_s4 = scalar_lea.vmem [#allocation2], %s1046_s27  ;;  %p1585_p9 = pnand %p1305_p8, %p1561_p3 }
   0xf   : > { %s177_s5 = sshll.u32 %s169_s4, 4  ;;  %s1591_s7 = scalar_lea.sflag [#allocation3], %s165_s25  ;;  %s1589_s5 = int_to_ptr.vmem [resolvable:$true] %s177_s5 }
  0x10   : > { %s1420_s8 = scalar_lea.hbm %s1581_s30, 4096  ;;  %p1422_p11 = pneg %p1585_p9 }
  0x11   : > { %p1421_p10 = scmp.ne.s32.totalorder %s1581_s30, %s1420_s8  ;;  %s1425_s11 = scalar_lea.hbm %s1833_s0, 8192 }
  0x12   : > { %p1426_p0 = scmp.lt.u32.totalorder %s1581_s30, %s1833_s0  ;;  %p1427_p1 = scmp.lt.u32.totalorder %s1425_s11, %s1420_s8 }
  0x13   : > { %p1423_p12 = pnand %p1422_p11, %p1421_p10  ;;  %p1429_p3 = scmp.lt.u32.totalorder %s1420_s8, %s1581_s30 }
  0x14   : > { %p1428_p2 = por %p1427_p1, %p1426_p0 }
  0x15   : > { %p1424_p13 = pneg %p1423_p12 }
  0x16   : > { %p1430_p4 = por %p1429_p3, %p1428_p2 }
  0x18   : > { %p1431_p5 = pnand %p1430_p4, %p1424_p13 }
  0x1a   : > { %1434 = shalt.err (!%p1431_p5)
}
  0x1b   : > { %s1435_s20 = scalar_lea.vmem %s1589_s5, 4096  ;;  %s1502_s21 = smov [#allocation2]  }
  0x1c   : > { %p1436_p6 = scmp.ne.s32.totalorder %s1589_s5, %s1435_s20  ;;  %s1440_s22 = sshll.u32 %s1502_s21, 4  ;;  %s1441_s22 = int_to_ptr.vmem [resolvable:$false] %s1440_s22 }
  0x1d   : > { %s1442_s25 = scalar_lea.vmem %s1441_s22, 8192  ;;  %p1443_p12 = scmp.lt.s32.totalorder %s1589_s5, %s1441_s22 }
  0x1e   : > { %p1438_p8 = pnand %p1436_p6, %p1422_p11  ;;  %p1444_p0 = scmp.lt.s32.totalorder %s1442_s25, %s1435_s20 }
  0x20   : > { %p1439_p10 = pneg %p1438_p8  ;;  %p1445_p1 = por %p1444_p0, %p1443_p12 }
  0x22   : > { %p1446_p2 = pnand %p1445_p1, %p1439_p10 }
  0x24   : > { %1449 = shalt.err (!%p1446_p2)
}
  0x25   : > { %s1503_s26 = smov 128   ;;  %s1504_s27 = smov 8  }
  0x26   : > { %1304 = dma.hbm_to_vmem [thread:$0]  (!%p1585_p9), %s1581_s30, 4096, %s1589_s5, %s1591_s7, %s1503_s26, %s1503_s26, %s1504_s27  }
  0x27   : > { %p1050_p11 = scmp.ge.s32.totalorder %s1500_s17, 1  ;;  %p185_p13 = scmp.lt.s32.totalorder %s1500_s17, 3 }
  0x29   : > { %p186_p3 = pnand %p1050_p11, %p185_p13 }
  0x2a   : > { %s191_s28 = sand.u32 (!%p186_p3), 1, %s1484_s13  }
  0x2b   : > { %189 = sbr.rel (%p186_p3) target bundleno = 364 (0x16c), region = 32  ;;  %s1051_s29 = sshll.u32 (!%p186_p3), %s191_s28, 8 }
  0x2c   : > { %s192_s4 = scalar_lea.sflag (!%p186_p3), [#allocation3], %s191_s28  ;;  %s1622_s8 = scalar_lea.vmem (!%p186_p3), [#allocation2], %s1051_s29 }
  0x32   : > { %1475 = dma.done.wait (%p1568_p7), %s192_s4, 4096  }
  0x33   : > { %1477 = vsyncadd (%p1568_p7), %s192_s4, 4294963200  ;;  %v1356_v0 = vld [vmem:[%s1834_s1 + $0x40] sm:$0xff]   ;;  %v1358_v2 = vld [vmem:[%s1834_s1 + $0x48] sm:$0xff]   ;;  %s1052_s25 = sshll.u32 %s1492_s15, 5  ;;  %vm894_vm0 = vcmask 519168  }
  0x34   : > { %v1357_v1 = vld [vmem:[%s1834_s1] sm:$0xff]   ;;  %1171 = vmatprep.subr.bf16.mxu0 %v1356_v0  ;;  %1283 = vmatprep.subr.bf16.mxu1 %v1356_v0  ;;  %v1359_v3 = vld [vmem:[%s1834_s1 + $0x8] sm:$0xff]   ;;  %v1360_v4 = vld [vmem:[%s1834_s1 + $0x50] sm:$0xff]   ;;  %p237_p7 = scmp.lt.s32.totalorder %s1052_s25, 63 }
  0x35   : > { %1172 = vmatpush3.bf16.msra.mxu0 %v1357_v1  ;;  %1291 = vmatpush3.bf16.msra.mxu1 %v1357_v1  ;;  %v1361_v5 = vld [vmem:[%s1834_s1 + $0x10] sm:$0xff]   ;;  %v1362_v6 = vld [vmem:[%s1834_s1 + $0x58] sm:$0xff]   ;;  %v1364_v8 = vld [vmem:[%s1834_s1 + $0x60] sm:$0xff]  }
  0x36   : > { %1173 = vmatprep.subr.bf16.mxu0 %v1358_v2  ;;  %1284 = vmatprep.subr.bf16.mxu1 %v1358_v2  ;;  %v1363_v7 = vld [vmem:[%s1834_s1 + $0x18] sm:$0xff]   ;;  %v1365_v9 = vld [vmem:[%s1834_s1 + $0x20] sm:$0xff]   ;;  %v1366_v10 = vld [vmem:[%s1834_s1 + $0x68] sm:$0xff]   ;;  %s1848_s25 = smov (!%p237_p7, %s1052_s25), 63 }
  0x37   : > { %v1374_v11 = vld [vmem:[%s1622_s8 + $0x4] ss:$8 sps:$4 sm:$0xff]   ;;  %v1368_v14 = vld [vmem:[%s1834_s1 + $0x70] sm:$0xff]   ;;  %v1370_v16 = vld [vmem:[%s1834_s1 + $0x78] sm:$0xff]  }
  0x38   : > { %v1377_v12 = vld [vmem:[%s1622_s8 + $0x84] ss:$8 sps:$4 sm:$0xff]   ;;  %605 = vmatprep.mubr.bf16.mxu0 %v1374_v11  ;;  %v1369_v15 = vld [vmem:[%s1834_s1 + $0x30] sm:$0xff]   ;;  %v1371_v17 = vld [vmem:[%s1834_s1 + $0x38] sm:$0xff]  }
  0x39   : > { %1174 = vmatpush3.bf16.msra.mxu0 %v1359_v3  ;;  %1292 = vmatpush3.bf16.msra.mxu1 %v1359_v3  ;;  %v1367_v13 = vld [vmem:[%s1834_s1 + $0x28] sm:$0xff]   ;;  %v1378_v20 = vld [vmem:[%s1622_s8 + $0x14] ss:$8 sps:$4 sm:$0xff]   ;;  %v1382_v22 = vld [vmem:[%s1622_s8 + $0x10] ss:$8 sps:$4 sm:$0xff]  }
  0x3a   : > { %1175 = vmatprep.subr.bf16.mxu0 %v1360_v4  ;;  %1285 = vmatprep.subr.bf16.mxu1 %v1360_v4  ;;  %v1372_v18 = vld [vmem:[%s1622_s8] ss:$8 sps:$4 sm:$0xff]   ;;  %v1380_v21 = vld [vmem:[%s1622_s8 + $0x94] ss:$8 sps:$4 sm:$0xff]   ;;  %v1383_v23 = vld [vmem:[%s1622_s8 + $0x90] ss:$8 sps:$4 sm:$0xff]  }
  0x3b   : > { %669 = vmatprep.mubr.bf16.mxu1 %v1377_v12  ;;  %v1375_v19 = vld [vmem:[%s1622_s8 + $0x80] ss:$8 sps:$4 sm:$0xff]   ;;  %v1384_v24 = vld [vmem:[%s1622_s8 + $0x24] ss:$8 sps:$4 sm:$0xff]   ;;  %v1390_v28 = vld [vmem:[%s1622_s8 + $0x34] ss:$8 sps:$4 sm:$0xff]  }
  0x3c   : > { %v1386_v25 = vld [vmem:[%s1622_s8 + $0xa4] ss:$8 sps:$4 sm:$0xff]   ;;  %v1388_v26 = vld [vmem:[%s1622_s8 + $0x20] ss:$8 sps:$4 sm:$0xff]   ;;  %v1392_v29 = vld [vmem:[%s1622_s8 + $0xb4] ss:$8 sps:$4 sm:$0xff]  }
  0x3d   : > { %1176 = vmatpush3.bf16.msra.mxu0 %v1361_v5  ;;  %1293 = vmatpush3.bf16.msra.mxu1 %v1361_v5  ;;  %v1389_v27 = vld [vmem:[%s1622_s8 + $0xa0] ss:$8 sps:$4 sm:$0xff]   ;;  %v1394_v30 = vld [vmem:[%s1622_s8 + $0x30] ss:$8 sps:$4 sm:$0xff]   ;;  %v1396_v32 = vld [vmem:[%s1622_s8 + $0x44] ss:$8 sps:$4 sm:$0xff]  }
  0x3e   : > { %1177 = vmatprep.subr.bf16.mxu0 %v1362_v6  ;;  %1286 = vmatprep.subr.bf16.mxu1 %v1362_v6  ;;  %v1395_v31 = vld [vmem:[%s1622_s8 + $0xb0] ss:$8 sps:$4 sm:$0xff]   ;;  %v1398_v33 = vld [vmem:[%s1622_s8 + $0xc4] ss:$8 sps:$4 sm:$0xff]   ;;  %v1400_v34 = vld [vmem:[%s1622_s8 + $0x40] ss:$8 sps:$4 sm:$0xff]  }
  0x3f   : > { %v1401_v35 = vld [vmem:[%s1622_s8 + $0xc0] ss:$8 sps:$4 sm:$0xff]   ;;  %v1402_v36 = vld [vmem:[%s1622_s8 + $0x54] ss:$8 sps:$4 sm:$0xff]   ;;  %v1406_v38 = vld [vmem:[%s1622_s8 + $0x50] ss:$8 sps:$4 sm:$0xff]  }
  0x40   : > { %v1404_v37 = vld [vmem:[%s1622_s8 + $0xd4] ss:$8 sps:$4 sm:$0xff]   ;;  %v1407_v39 = vld [vmem:[%s1622_s8 + $0xd0] ss:$8 sps:$4 sm:$0xff]   ;;  %v1408_v40 = vld [vmem:[%s1622_s8 + $0x64] ss:$8 sps:$4 sm:$0xff]  }
  0x41   : > { %1178 = vmatpush3.bf16.msra.mxu0 %v1363_v7  ;;  %1294 = vmatpush3.bf16.msra.mxu1 %v1363_v7  ;;  %v1410_v41 = vld [vmem:[%s1622_s8 + $0xe4] ss:$8 sps:$4 sm:$0xff]   ;;  %v1412_v42 = vld [vmem:[%s1622_s8 + $0x60] ss:$8 sps:$4 sm:$0xff]   ;;  %v1414_v44 = vld [vmem:[%s1622_s8 + $0x74] ss:$8 sps:$4 sm:$0xff]  }
  0x42   : > { %1179 = vmatprep.subr.bf16.mxu0 %v1364_v8  ;;  %1287 = vmatprep.subr.bf16.mxu1 %v1364_v8  ;;  %v1413_v43 = vld [vmem:[%s1622_s8 + $0xe0] ss:$8 sps:$4 sm:$0xff]   ;;  %v1416_v45 = vld [vmem:[%s1622_s8 + $0xf4] ss:$8 sps:$4 sm:$0xff]   ;;  %v1418_v46 = vld [vmem:[%s1622_s8 + $0x70] ss:$8 sps:$4 sm:$0xff]  }
  0x43   : > { %v1419_v47 = vld [vmem:[%s1622_s8 + $0xf0] ss:$8 sps:$4 sm:$0xff]   ;;  %v1712_v50 = vld [vmem:[%s1835_s2] ss:$0 sm:$0xff]  ;;  %s1053_s8 = sshll.u32 %s1848_s25, 2 }
  0x44   : > { %s1721_s29 = scalar_lea.vmem %s1836_s3, %s1053_s8 }
  0x45   : > { %1180 = vmatpush3.bf16.msra.mxu0 %v1365_v9  ;;  %1295 = vmatpush3.bf16.msra.mxu1 %v1365_v9 }
  0x46   : > { %1181 = vmatprep.subr.bf16.mxu0 %v1366_v10  ;;  %1288 = vmatprep.subr.bf16.mxu1 %v1366_v10 }
  0x49   : > { %1182 = vmatpush3.bf16.msra.mxu0 %v1367_v13  ;;  %1296 = vmatpush3.bf16.msra.mxu1 %v1367_v13 }
  0x4a   : > { %1183 = vmatprep.subr.bf16.mxu0 %v1368_v14  ;;  %1289 = vmatprep.subr.bf16.mxu1 %v1368_v14 }
  0x4d   : > { %1184 = vmatpush3.bf16.msra.mxu0 %v1369_v15  ;;  %1297 = vmatpush3.bf16.msra.mxu1 %v1369_v15 }
  0x4e   : > { %1185 = vmatprep.subr.bf16.mxu0 %v1370_v16  ;;  %1290 = vmatprep.subr.bf16.mxu1 %v1370_v16 }
  0x51   : > { %1186 = vmatpush3.bf16.msra.mxu0 %v1371_v17  ;;  %1298 = vmatpush3.bf16.msra.mxu1 %v1371_v17 }
  0x54   : > { %606 = vmatmul.mubr.bf16.vlgmr.msra.gmra.mrb[0].mxu0 %v1372_v18  ;;  %670 = vmatmul.mubr.bf16.vlgmr.msra.gmra.mrb[0].mxu1 %v1375_v19 }
  0x55   : > { %613 = vmatprep.mubr.bf16.mxu0 %v1378_v20  ;;  %677 = vmatprep.mubr.bf16.mxu1 %v1380_v21 }
  0x5c   : > { %614 = vmatmul.mubr.bf16.gmra.mrb[4].mxu0 %v1382_v22  ;;  %678 = vmatmul.mubr.bf16.gmra.mrb[4].mxu1 %v1383_v23 }
  0x5d   : > { %621 = vmatprep.mubr.bf16.mxu0 %v1384_v24  ;;  %685 = vmatprep.mubr.bf16.mxu1 %v1386_v25 }
  0x64   : > { %622 = vmatmul.mubr.bf16.gmra.mrb[8].mxu0 %v1388_v26  ;;  %686 = vmatmul.mubr.bf16.gmra.mrb[8].mxu1 %v1389_v27 }
  0x65   : > { %629 = vmatprep.mubr.bf16.mxu0 %v1390_v28  ;;  %693 = vmatprep.mubr.bf16.mxu1 %v1392_v29 }
  0x6c   : > { %630 = vmatmul.mubr.bf16.gmra.mrb[12].mxu0 %v1394_v30  ;;  %694 = vmatmul.mubr.bf16.gmra.mrb[12].mxu1 %v1395_v31 }
  0x6d   : > { %637 = vmatprep.mubr.bf16.mxu0 %v1396_v32  ;;  %701 = vmatprep.mubr.bf16.mxu1 %v1398_v33 }
  0x74   : > { %638 = vmatmul.mubr.bf16.gmra.mrb[16].mxu0 %v1400_v34  ;;  %702 = vmatmul.mubr.bf16.gmra.mrb[16].mxu1 %v1401_v35 }
  0x75   : > { %645 = vmatprep.mubr.bf16.mxu0 %v1402_v36  ;;  %709 = vmatprep.mubr.bf16.mxu1 %v1404_v37 }
  0x7c   : > { %646 = vmatmul.mubr.bf16.gmra.mrb[20].mxu0 %v1406_v38  ;;  %710 = vmatmul.mubr.bf16.gmra.mrb[20].mxu1 %v1407_v39 }
  0x7d   : > { %653 = vmatprep.mubr.bf16.mxu0 %v1408_v40  ;;  %717 = vmatprep.mubr.bf16.mxu1 %v1410_v41 }
  0x84   : > { %654 = vmatmul.mubr.bf16.gmra.mrb[24].mxu0 %v1412_v42  ;;  %718 = vmatmul.mubr.bf16.gmra.mrb[24].mxu1 %v1413_v43 }
  0x85   : > { %661 = vmatprep.mubr.bf16.mxu0 %v1414_v44  ;;  %725 = vmatprep.mubr.bf16.mxu1 %v1416_v45 }
  0x8c   : > { %662 = vmatmul.mubr.bf16.gmra.mrb[28].mxu0 %v1418_v46  ;;  %726 = vmatmul.mubr.bf16.gmra.mrb[28].mxu1 %v1419_v47 }
 0x127   : > { %v1187_v48 = vpop.f32.mrb[0].mxu0  ;;  %v1235_v49 = vpop.f32.mrb[0].mxu1 }
 0x128   : > { %v1188_v51 = vpop.f32.mrb[1].mxu0  ;;  %v1236_v52 = vpop.f32.mrb[1].mxu1 }
 0x129   : > { %v1189_v53 = vadd.f32 %v1188_v51, %v1187_v48  ;;  %v1237_v54 = vadd.f32 %v1236_v52, %v1235_v49  ;;  %v1190_v55 = vpop.f32.mrb[2].mxu0  ;;  %v1238_v56 = vpop.f32.mrb[2].mxu1 }
 0x12a   : > { %v1191_v57 = vpop.f32.mrb[3].mxu0  ;;  %v1239_v58 = vpop.f32.mrb[3].mxu1 }
 0x12b   : > { %v608_v59 = vadd.f32 %v1189_v53, %v1712_v50  ;;  %v672_v60 = vadd.f32 %v1237_v54, %v1712_v50  ;;  %v1192_v61 = vadd.f32 %v1191_v57, %v1190_v55  ;;  %v1240_v62 = vadd.f32 %v1239_v58, %v1238_v56 }
 0x12d   : > { %v734_v63 = vmax.f32 %v608_v59, 0.0  ;;  %v750_v0 = vmax.f32 %v672_v60, 0.0  ;;  %v611_v1 = vadd.f32 %v1192_v61, %v1712_v50  ;;  %v675_v2 = vadd.f32 %v1240_v62, %v1712_v50 }
 0x12f   : > { %v1139_v3 = vpack.c.bf16 %v734_v63, %v734_v63  ;;  %v1155_v4 = vpack.c.bf16 %v750_v0, %v750_v0  ;;  %v735_v5 = vmax.f32 %v611_v1, 0.0  ;;  %v751_v6 = vmax.f32 %v675_v2, 0.0  ;;  %v1193_v7 = vpop.f32.mrb[4].mxu0  ;;  %v1241_v8 = vpop.f32.mrb[4].mxu1 }
 0x130   : > { %v1194_v9 = vpop.f32.mrb[5].mxu0  ;;  %v1242_v10 = vpop.f32.mrb[5].mxu1 }
 0x131   : > { %895 = vst.msk [vmem:[%s1721_s29] sm:$0xf] %vm894_vm0, %v1139_v3  ;;  %911 = vst.msk [vmem:[%s1721_s29 + $0x40] sm:$0xf] %vm894_vm0, %v1155_v4  ;;  %v1140_v11 = vpack.c.bf16 %v735_v5, %v735_v5  ;;  %v1156_v12 = vpack.c.bf16 %v751_v6, %v751_v6  ;;  %v1195_v13 = vadd.f32 %v1194_v9, %v1193_v7  ;;  %v1196_v15 = vpop.f32.mrb[6].mxu0  ;;  %v1244_v16 = vpop.f32.mrb[6].mxu1 }
 0x132   : > { %v1243_v14 = vadd.f32 %v1242_v10, %v1241_v8  ;;  %v1197_v17 = vpop.f32.mrb[7].mxu0  ;;  %v1245_v18 = vpop.f32.mrb[7].mxu1 }
 0x133   : > { %896 = vst.msk [vmem:[%s1721_s29 + $0x4] sm:$0xf] %vm894_vm0, %v1140_v11  ;;  %912 = vst.msk [vmem:[%s1721_s29 + $0x44] sm:$0xf] %vm894_vm0, %v1156_v12  ;;  %v616_v19 = vadd.f32 %v1195_v13, %v1712_v50  ;;  %v1198_v21 = vadd.f32 %v1197_v17, %v1196_v15  ;;  %v1246_v22 = vadd.f32 %v1245_v18, %v1244_v16 }
 0x134   : > { %v680_v20 = vadd.f32 %v1243_v14, %v1712_v50 }
 0x135   : > { %v736_v23 = vmax.f32 %v616_v19, 0.0  ;;  %v619_v25 = vadd.f32 %v1198_v21, %v1712_v50  ;;  %v683_v26 = vadd.f32 %v1246_v22, %v1712_v50 }
 0x136   : > { %v752_v24 = vmax.f32 %v680_v20, 0.0 }
 0x137   : > { %v1141_v27 = vpack.c.bf16 %v736_v23, %v736_v23  ;;  %v737_v29 = vmax.f32 %v619_v25, 0.0  ;;  %v753_v30 = vmax.f32 %v683_v26, 0.0  ;;  %v1199_v31 = vpop.f32.mrb[8].mxu0  ;;  %v1247_v32 = vpop.f32.mrb[8].mxu1 }
 0x138   : > { %v1157_v28 = vpack.c.bf16 %v752_v24, %v752_v24  ;;  %v1200_v33 = vpop.f32.mrb[9].mxu0  ;;  %v1248_v34 = vpop.f32.mrb[9].mxu1 }
 0x139   : > { %897 = vst.msk [vmem:[%s1721_s29 + $0x8] sm:$0xf] %vm894_vm0, %v1141_v27  ;;  %v1142_v35 = vpack.c.bf16 %v737_v29, %v737_v29  ;;  %v1158_v36 = vpack.c.bf16 %v753_v30, %v753_v30  ;;  %v1201_v37 = vadd.f32 %v1200_v33, %v1199_v31  ;;  %v1249_v38 = vadd.f32 %v1248_v34, %v1247_v32  ;;  %v1202_v39 = vpop.f32.mrb[10].mxu0  ;;  %v1250_v40 = vpop.f32.mrb[10].mxu1 }
 0x13a   : > { %913 = vst.msk [vmem:[%s1721_s29 + $0x48] sm:$0xf] %vm894_vm0, %v1157_v28  ;;  %v1203_v41 = vpop.f32.mrb[11].mxu0  ;;  %v1251_v42 = vpop.f32.mrb[11].mxu1 }
 0x13b   : > { %898 = vst.msk [vmem:[%s1721_s29 + $0xc] sm:$0xf] %vm894_vm0, %v1142_v35  ;;  %914 = vst.msk [vmem:[%s1721_s29 + $0x4c] sm:$0xf] %vm894_vm0, %v1158_v36  ;;  %v624_v43 = vadd.f32 %v1201_v37, %v1712_v50  ;;  %v688_v44 = vadd.f32 %v1249_v38, %v1712_v50  ;;  %v1204_v45 = vadd.f32 %v1203_v41, %v1202_v39 }
 0x13c   : > { %v1252_v46 = vadd.f32 %v1251_v42, %v1250_v40 }
 0x13d   : > { %v738_v47 = vmax.f32 %v624_v43, 0.0  ;;  %v754_v48 = vmax.f32 %v688_v44, 0.0  ;;  %v627_v49 = vadd.f32 %v1204_v45, %v1712_v50 }
 0x13e   : > { %v691_v51 = vadd.f32 %v1252_v46, %v1712_v50 }
 0x13f   : > { %v1143_v52 = vpack.c.bf16 %v738_v47, %v738_v47  ;;  %v1159_v53 = vpack.c.bf16 %v754_v48, %v754_v48  ;;  %v739_v54 = vmax.f32 %v627_v49, 0.0  ;;  %v1205_v56 = vpop.f32.mrb[12].mxu0  ;;  %v1253_v57 = vpop.f32.mrb[12].mxu1 }
 0x140   : > { %v755_v55 = vmax.f32 %v691_v51, 0.0  ;;  %v1206_v58 = vpop.f32.mrb[13].mxu0  ;;  %v1254_v59 = vpop.f32.mrb[13].mxu1 }
 0x141   : > { %899 = vst.msk [vmem:[%s1721_s29 + $0x10] sm:$0xf] %vm894_vm0, %v1143_v52  ;;  %915 = vst.msk [vmem:[%s1721_s29 + $0x50] sm:$0xf] %vm894_vm0, %v1159_v53  ;;  %v1144_v60 = vpack.c.bf16 %v739_v54, %v739_v54  ;;  %v1207_v62 = vadd.f32 %v1206_v58, %v1205_v56  ;;  %v1255_v63 = vadd.f32 %v1254_v59, %v1253_v57  ;;  %v1208_v0 = vpop.f32.mrb[14].mxu0  ;;  %v1256_v1 = vpop.f32.mrb[14].mxu1 }
 0x142   : > { %v1160_v61 = vpack.c.bf16 %v755_v55, %v755_v55  ;;  %v1209_v2 = vpop.f32.mrb[15].mxu0  ;;  %v1257_v3 = vpop.f32.mrb[15].mxu1 }
 0x143   : > { %900 = vst.msk [vmem:[%s1721_s29 + $0x14] sm:$0xf] %vm894_vm0, %v1144_v60  ;;  %v632_v4 = vadd.f32 %v1207_v62, %v1712_v50  ;;  %v696_v5 = vadd.f32 %v1255_v63, %v1712_v50  ;;  %v1210_v6 = vadd.f32 %v1209_v2, %v1208_v0  ;;  %v1258_v7 = vadd.f32 %v1257_v3, %v1256_v1 }
 0x144   : > { %916 = vst.msk [vmem:[%s1721_s29 + $0x54] sm:$0xf] %vm894_vm0, %v1160_v61 }
 0x145   : > { %v740_v8 = vmax.f32 %v632_v4, 0.0  ;;  %v756_v9 = vmax.f32 %v696_v5, 0.0  ;;  %v635_v10 = vadd.f32 %v1210_v6, %v1712_v50  ;;  %v699_v11 = vadd.f32 %v1258_v7, %v1712_v50 }
 0x147   : > { %v1145_v12 = vpack.c.bf16 %v740_v8, %v740_v8  ;;  %v1161_v13 = vpack.c.bf16 %v756_v9, %v756_v9  ;;  %v741_v14 = vmax.f32 %v635_v10, 0.0  ;;  %v757_v15 = vmax.f32 %v699_v11, 0.0  ;;  %v1211_v16 = vpop.f32.mrb[16].mxu0  ;;  %v1259_v17 = vpop.f32.mrb[16].mxu1 }
 0x148   : > { %v1212_v18 = vpop.f32.mrb[17].mxu0  ;;  %v1260_v19 = vpop.f32.mrb[17].mxu1 }
 0x149   : > { %901 = vst.msk [vmem:[%s1721_s29 + $0x18] sm:$0xf] %vm894_vm0, %v1145_v12  ;;  %917 = vst.msk [vmem:[%s1721_s29 + $0x58] sm:$0xf] %vm894_vm0, %v1161_v13  ;;  %v1146_v20 = vpack.c.bf16 %v741_v14, %v741_v14  ;;  %v1162_v21 = vpack.c.bf16 %v757_v15, %v757_v15  ;;  %v1213_v22 = vadd.f32 %v1212_v18, %v1211_v16  ;;  %v1214_v24 = vpop.f32.mrb[18].mxu0  ;;  %v1262_v25 = vpop.f32.mrb[18].mxu1 }
 0x14a   : > { %v1261_v23 = vadd.f32 %v1260_v19, %v1259_v17  ;;  %v1215_v26 = vpop.f32.mrb[19].mxu0  ;;  %v1263_v27 = vpop.f32.mrb[19].mxu1 }
 0x14b   : > { %902 = vst.msk [vmem:[%s1721_s29 + $0x1c] sm:$0xf] %vm894_vm0, %v1146_v20  ;;  %918 = vst.msk [vmem:[%s1721_s29 + $0x5c] sm:$0xf] %vm894_vm0, %v1162_v21  ;;  %v640_v28 = vadd.f32 %v1213_v22, %v1712_v50  ;;  %v1216_v30 = vadd.f32 %v1215_v26, %v1214_v24  ;;  %v1264_v31 = vadd.f32 %v1263_v27, %v1262_v25 }
 0x14c   : > { %v704_v29 = vadd.f32 %v1261_v23, %v1712_v50 }
 0x14d   : > { %v742_v32 = vmax.f32 %v640_v28, 0.0  ;;  %v643_v34 = vadd.f32 %v1216_v30, %v1712_v50  ;;  %v707_v35 = vadd.f32 %v1264_v31, %v1712_v50 }
 0x14e   : > { %v758_v33 = vmax.f32 %v704_v29, 0.0 }
 0x14f   : > { %v1147_v36 = vpack.c.bf16 %v742_v32, %v742_v32  ;;  %v743_v38 = vmax.f32 %v643_v34, 0.0  ;;  %v759_v39 = vmax.f32 %v707_v35, 0.0  ;;  %v1217_v40 = vpop.f32.mrb[20].mxu0  ;;  %v1265_v41 = vpop.f32.mrb[20].mxu1 }
 0x150   : > { %v1163_v37 = vpack.c.bf16 %v758_v33, %v758_v33  ;;  %v1218_v42 = vpop.f32.mrb[21].mxu0  ;;  %v1266_v43 = vpop.f32.mrb[21].mxu1 }
 0x151   : > { %903 = vst.msk [vmem:[%s1721_s29 + $0x20] sm:$0xf] %vm894_vm0, %v1147_v36  ;;  %v1148_v44 = vpack.c.bf16 %v743_v38, %v743_v38  ;;  %v1164_v45 = vpack.c.bf16 %v759_v39, %v759_v39  ;;  %v1219_v46 = vadd.f32 %v1218_v42, %v1217_v40  ;;  %v1267_v47 = vadd.f32 %v1266_v43, %v1265_v41  ;;  %v1220_v48 = vpop.f32.mrb[22].mxu0  ;;  %v1268_v49 = vpop.f32.mrb[22].mxu1 }
 0x152   : > { %919 = vst.msk [vmem:[%s1721_s29 + $0x60] sm:$0xf] %vm894_vm0, %v1163_v37  ;;  %v1221_v51 = vpop.f32.mrb[23].mxu0  ;;  %v1269_v52 = vpop.f32.mrb[23].mxu1 }
 0x153   : > { %904 = vst.msk [vmem:[%s1721_s29 + $0x24] sm:$0xf] %vm894_vm0, %v1148_v44  ;;  %920 = vst.msk [vmem:[%s1721_s29 + $0x64] sm:$0xf] %vm894_vm0, %v1164_v45  ;;  %v648_v53 = vadd.f32 %v1219_v46, %v1712_v50  ;;  %v712_v54 = vadd.f32 %v1267_v47, %v1712_v50  ;;  %v1222_v55 = vadd.f32 %v1221_v51, %v1220_v48 }
 0x154   : > { %v1270_v56 = vadd.f32 %v1269_v52, %v1268_v49 }
 0x155   : > { %v744_v57 = vmax.f32 %v648_v53, 0.0  ;;  %v760_v58 = vmax.f32 %v712_v54, 0.0  ;;  %v651_v59 = vadd.f32 %v1222_v55, %v1712_v50 }
 0x156   : > { %v715_v60 = vadd.f32 %v1270_v56, %v1712_v50 }
 0x157   : > { %v1149_v61 = vpack.c.bf16 %v744_v57, %v744_v57  ;;  %v1165_v62 = vpack.c.bf16 %v760_v58, %v760_v58  ;;  %v745_v63 = vmax.f32 %v651_v59, 0.0  ;;  %v1223_v1 = vpop.f32.mrb[24].mxu0  ;;  %v1271_v2 = vpop.f32.mrb[24].mxu1 }
 0x158   : > { %v761_v0 = vmax.f32 %v715_v60, 0.0  ;;  %v1224_v3 = vpop.f32.mrb[25].mxu0  ;;  %v1272_v4 = vpop.f32.mrb[25].mxu1 }
 0x159   : > { %905 = vst.msk [vmem:[%s1721_s29 + $0x28] sm:$0xf] %vm894_vm0, %v1149_v61  ;;  %921 = vst.msk [vmem:[%s1721_s29 + $0x68] sm:$0xf] %vm894_vm0, %v1165_v62  ;;  %v1150_v5 = vpack.c.bf16 %v745_v63, %v745_v63  ;;  %v1225_v7 = vadd.f32 %v1224_v3, %v1223_v1  ;;  %v1273_v8 = vadd.f32 %v1272_v4, %v1271_v2  ;;  %v1226_v9 = vpop.f32.mrb[26].mxu0  ;;  %v1274_v10 = vpop.f32.mrb[26].mxu1 }
 0x15a   : > { %v1166_v6 = vpack.c.bf16 %v761_v0, %v761_v0  ;;  %v1227_v11 = vpop.f32.mrb[27].mxu0  ;;  %v1275_v12 = vpop.f32.mrb[27].mxu1 }
 0x15b   : > { %906 = vst.msk [vmem:[%s1721_s29 + $0x2c] sm:$0xf] %vm894_vm0, %v1150_v5  ;;  %v656_v13 = vadd.f32 %v1225_v7, %v1712_v50  ;;  %v720_v14 = vadd.f32 %v1273_v8, %v1712_v50  ;;  %v1228_v15 = vadd.f32 %v1227_v11, %v1226_v9  ;;  %v1276_v16 = vadd.f32 %v1275_v12, %v1274_v10 }
 0x15c   : > { %922 = vst.msk [vmem:[%s1721_s29 + $0x6c] sm:$0xf] %vm894_vm0, %v1166_v6 }
 0x15d   : > { %v746_v17 = vmax.f32 %v656_v13, 0.0  ;;  %v762_v18 = vmax.f32 %v720_v14, 0.0  ;;  %v659_v19 = vadd.f32 %v1228_v15, %v1712_v50  ;;  %v723_v20 = vadd.f32 %v1276_v16, %v1712_v50 }
 0x15f   : > { %v1151_v21 = vpack.c.bf16 %v746_v17, %v746_v17  ;;  %v1167_v22 = vpack.c.bf16 %v762_v18, %v762_v18  ;;  %v747_v23 = vmax.f32 %v659_v19, 0.0  ;;  %v763_v24 = vmax.f32 %v723_v20, 0.0  ;;  %v1229_v25 = vpop.f32.mrb[28].mxu0  ;;  %v1277_v26 = vpop.f32.mrb[28].mxu1 }
 0x160   : > { %v1230_v27 = vpop.f32.mrb[29].mxu0  ;;  %v1278_v28 = vpop.f32.mrb[29].mxu1 }
 0x161   : > { %907 = vst.msk [vmem:[%s1721_s29 + $0x30] sm:$0xf] %vm894_vm0, %v1151_v21  ;;  %923 = vst.msk [vmem:[%s1721_s29 + $0x70] sm:$0xf] %vm894_vm0, %v1167_v22  ;;  %v1152_v29 = vpack.c.bf16 %v747_v23, %v747_v23  ;;  %v1168_v30 = vpack.c.bf16 %v763_v24, %v763_v24  ;;  %v1231_v31 = vadd.f32 %v1230_v27, %v1229_v25  ;;  %v1232_v33 = vpop.f32.mrb[30].mxu0  ;;  %v1280_v34 = vpop.f32.mrb[30].mxu1 }
 0x162   : > { %v1279_v32 = vadd.f32 %v1278_v28, %v1277_v26  ;;  %v1233_v35 = vpop.f32.mrb[31].mxu0  ;;  %v1281_v36 = vpop.f32.mrb[31].mxu1 }
 0x163   : > { %908 = vst.msk [vmem:[%s1721_s29 + $0x34] sm:$0xf] %vm894_vm0, %v1152_v29  ;;  %924 = vst.msk [vmem:[%s1721_s29 + $0x74] sm:$0xf] %vm894_vm0, %v1168_v30  ;;  %v664_v37 = vadd.f32 %v1231_v31, %v1712_v50  ;;  %v1234_v39 = vadd.f32 %v1233_v35, %v1232_v33  ;;  %v1282_v40 = vadd.f32 %v1281_v36, %v1280_v34 }
 0x164   : > { %v728_v38 = vadd.f32 %v1279_v32, %v1712_v50 }
 0x165   : > { %v748_v41 = vmax.f32 %v664_v37, 0.0  ;;  %v667_v43 = vadd.f32 %v1234_v39, %v1712_v50  ;;  %v731_v44 = vadd.f32 %v1282_v40, %v1712_v50 }
 0x166   : > { %v764_v42 = vmax.f32 %v728_v38, 0.0 }
 0x167   : > { %v1153_v45 = vpack.c.bf16 %v748_v41, %v748_v41  ;;  %v749_v47 = vmax.f32 %v667_v43, 0.0  ;;  %v765_v48 = vmax.f32 %v731_v44, 0.0 }
 0x168   : > { %v1169_v46 = vpack.c.bf16 %v764_v42, %v764_v42 }
 0x169   : > { %909 = vst.msk [vmem:[%s1721_s29 + $0x38] sm:$0xf] %vm894_vm0, %v1153_v45  ;;  %v1154_v49 = vpack.c.bf16 %v749_v47, %v749_v47  ;;  %v1170_v51 = vpack.c.bf16 %v765_v48, %v765_v48 }
 0x16a   : > { %925 = vst.msk [vmem:[%s1721_s29 + $0x78] sm:$0xf] %vm894_vm0, %v1169_v46 }
 0x16b   : > { %910 = vst.msk [vmem:[%s1721_s29 + $0x3c] sm:$0xf] %vm894_vm0, %v1154_v49  ;;  %926 = vst.msk [vmem:[%s1721_s29 + $0x7c] sm:$0xf] %vm894_vm0, %v1170_v51 }
 0x16c PF: > { %s16_s17 = sadd.s32 1, %s1500_s17   ;;  %s1840_s12 = smov %s1484_s13 }
 0x16d   : > { %p13_p9 = scmp.ge.s32.totalorder %s16_s17, 4   ;;  %s1841_s13 = smov %s1488_s14 }
 0x16e   : > { %s1842_s14 = smov %s1574_s24  ;;  %s1843_s15 = smov %s1496_s16 }
 0x16f   : > { %s1844_s16 = smov %s1846_s19  ;;  %15 = sbr.rel (!%p13_p9) target bundleno = 4 (0x4), region = 78 }
 0x176   :  { %955 = vsyncpa [#allocation3], 1 }
 0x177   :  { %957 = vsyncpa [#allocation3 + $0x1], 1 }

</bundles_post_ra>
